<compile_context>
chip_gen: v7x
topology: tpu7x:2x2x1
jax: 0.10.0
libtpu: 0.0.40
codegen_flags: <defaults>
</compile_context>

<pallas_src>
import math

import jax
import jax.numpy as jnp
from jax.experimental import pallas as pl
from jax.experimental.pallas import tpu as pltpu

PAD_ID = 0           # constants.tokens_to_id[constants.pad_token]
VOCAB = 16
HIDDEN = 32          # encoder.config.hidden_size (small synthetic value)
FFN = 4 * HIDDEN     # 128 — already lane-dense
DIM = 64             # RNAEncoder `dimension` (small synthetic value)
OUT_PAD = 128        # lane-dense output width (DIM padded with exact zeros)


# ---------------------------------------------------------------------------
# Fused kernel: embedding + masked self-attention (CLS query only) + FFN
#               + RNAEncoder head (relu -> Linear -> L2 normalize)
# Runs on one batch tile [TB, S]; weights stay resident across grid steps.
# ---------------------------------------------------------------------------
def _rna_encoder_kernel(tok_ref, emb_ref, wkv_ref, wqo_ref, w1_ref, w2_ref,
                        whead_ref, out_ref):
    tok = tok_ref[...]                                   # [TB, S] int32
    TB, S = tok.shape
    emb = emb_ref[...]                                   # [VOCAB, H]

    # ---- embedding lookup: one-hot @ table on the MXU ----------------------
    iota_v = jax.lax.broadcasted_iota(jnp.int32, (TB, S, VOCAB), 2)
    one_hot = (tok[:, :, None] == iota_v).astype(jnp.float32)
    one_hot = one_hot.reshape(TB * S, VOCAB)                               # [TB*S, V]
    x_flat = jnp.dot(one_hot, emb, preferred_element_type=jnp.float32)     # [TB*S, H]

    # CLS embedding via its own tiny one-hot matmul (no strided row slice)
    iota_c = jax.lax.broadcasted_iota(jnp.int32, (TB, VOCAB), 1)
    one_hot_cls = (tok[:, 0:1] == iota_c).astype(jnp.float32)              # [TB, V]
    x_cls = jnp.dot(one_hot_cls, emb, preferred_element_type=jnp.float32)  # [TB, H]

    # ---- fused K/V projection: one [H,2H] matmul over all positions --------
    kv = jnp.dot(x_flat, wkv_ref[...],
                 preferred_element_type=jnp.float32).reshape(TB, S, 2 * HIDDEN)
    k = kv[:, :, :HIDDEN]                                                  # [TB, S, H]
    v = kv[:, :, HIDDEN:]                                                  # [TB, S, H]

    wqo = wqo_ref[...]                                                     # [H, 2H]
    wq = wqo[:, :HIDDEN]
    wo = wqo[:, HIDDEN:]
    q_cls = jnp.dot(x_cls, wq, preferred_element_type=jnp.float32)         # [TB, H]

    # ---- masked single-head attention, CLS query only (batched MXU dots) ---
    scale = 1.0 / math.sqrt(HIDDEN)
    mask_bias = jnp.where(tok != PAD_ID, 0.0, -1e9).astype(jnp.float32)    # [TB, S]
    s = jnp.einsum('bqh,bsh->bqs', q_cls[:, None, :], k,
                   preferred_element_type=jnp.float32)                      # [TB,1,S]
    s = s * scale + mask_bias[:, None, :]
    s = s - jnp.max(s, axis=-1, keepdims=True)
    p = jnp.exp(s)
    p = p * pl.reciprocal(jnp.sum(p, axis=-1, keepdims=True), approx=True)
    ctx = jnp.einsum('bqs,bsh->bqh', p, v,
                     preferred_element_type=jnp.float32)[:, 0, :]            # [TB, H]
    attn = jnp.dot(ctx, wo, preferred_element_type=jnp.float32)              # [TB, H]

    # ---- residual + FFN, CLS row only ---------------------------------------
    h = x_cls + attn
    f = jnp.maximum(jnp.dot(h, w1_ref[...],
                            preferred_element_type=jnp.float32), 0.0)        # [TB, FFN]
    last_cls = h + jnp.dot(f, w2_ref[...],
                           preferred_element_type=jnp.float32)               # [TB, H]

    # ---- RNAEncoder head: relu(CLS) @ W + b, then L2-normalize rows ---------
    whead = whead_ref[...]                                                   # [H+1, 128]
    w_lin = whead[:HIDDEN, :]
    b_lin = whead[HIDDEN:HIDDEN + 1, :]
    y = jnp.dot(jnp.maximum(last_cls, 0.0), w_lin,
                preferred_element_type=jnp.float32) + b_lin                  # [TB, 128]
    ss = jnp.sum(y * y, axis=1, keepdims=True)
    out_ref[...] = y * jax.lax.rsqrt(jnp.maximum(ss, 1e-24))                 # eps-clamped


# ---------------------------------------------------------------------------
# Wrapper: one pallas_call, 1-D grid over batch tiles, weights VMEM-resident.
# ---------------------------------------------------------------------------
def rna_encoder_forward(tokens, params, *, batch_tile=None):
    B, S = tokens.shape
    if batch_tile is None:
        batch_tile = B if B <= 8 else 8
    TB = batch_tile
    assert B % TB == 0, "batch must be divisible by the batch tile"
    grid = (B // TB,)

    # ---- host-side weight packing (one-time) --------------------------------
    w_kv = jnp.concatenate([params['wk'], params['wv']], axis=1)             # [H, 2H]
    w_qo = jnp.concatenate([params['wq'], params['wo']], axis=1)             # [H, 2H]
    w_head = jnp.zeros((HIDDEN + 1, OUT_PAD), jnp.float32)
    w_head = w_head.at[:HIDDEN, :DIM].set(params['w_lin'])
    w_head = w_head.at[HIDDEN, :DIM].set(params['b_lin'][0])                 # bias row

    tok_spec = pl.BlockSpec((TB, S), lambda i: (i, 0))
    out_spec = pl.BlockSpec((TB, OUT_PAD), lambda i: (i, 0))

    def resident(shape):  # full-array block, same block index every step
        return pl.BlockSpec(shape, lambda i: (0, 0))

    in_specs = [
        tok_spec,
        resident((VOCAB, HIDDEN)),
        resident((HIDDEN, 2 * HIDDEN)),
        resident((HIDDEN, 2 * HIDDEN)),
        resident((HIDDEN, FFN)),
        resident((FFN, HIDDEN)),
        resident((HIDDEN + 1, OUT_PAD)),
    ]

    # advisory cost estimate so XLA can overlap the custom call
    per_seq_flops = (2 * S * VOCAB * HIDDEN + 2 * VOCAB * HIDDEN
                     + 2 * S * HIDDEN * 2 * HIDDEN
                     + 4 * HIDDEN * HIDDEN + 4 * S * HIDDEN
                     + 4 * HIDDEN * FFN + 2 * HIDDEN * OUT_PAD)
    weight_bytes = 4 * (VOCAB * HIDDEN + 2 * HIDDEN * 2 * HIDDEN
                        + 2 * HIDDEN * FFN + (HIDDEN + 1) * OUT_PAD)
    cost = pl.CostEstimate(
        flops=int(B * per_seq_flops),
        transcendentals=int(B * (S + 2)),
        bytes_accessed=int(4 * B * S + weight_bytes + 4 * B * OUT_PAD),
    )

    out_padded = pl.pallas_call(
        _rna_encoder_kernel,
        out_shape=jax.ShapeDtypeStruct((B, OUT_PAD), jnp.float32),
        grid=grid,
        in_specs=in_specs,
        out_specs=out_spec,
        compiler_params=pltpu.CompilerParams(dimension_semantics=("parallel",)),
        cost_estimate=cost,
    )(tokens, params['embedding'], w_kv, w_qo, params['w1'], params['w2'], w_head)

    return out_padded[:, :DIM]


# Pure-JAX reference for correctness checking (full-sequence encoder, then CLS).
def rna_encoder_ref(tokens, params):
    emb = params['embedding'][tokens]
    mask_bias = jnp.where(tokens != PAD_ID, 0.0, -1e9)
    hp = jax.lax.Precision.HIGHEST
    x = emb
    q = jnp.einsum('bsh,hd->bsd', x, params['wq'], precision=hp)
    k = jnp.einsum('bsh,hd->bsd', x, params['wk'], precision=hp)
    v = jnp.einsum('bsh,hd->bsd', x, params['wv'], precision=hp)
    s = jnp.einsum('bqd,bkd->bqk', q, k, precision=hp) / math.sqrt(HIDDEN)
    s = s + mask_bias[:, None, :]
    p = jax.nn.softmax(s, axis=-1)
    ctx = jnp.einsum('bqk,bkd->bqd', p, v, precision=hp)
    h = x + jnp.einsum('bsd,dh->bsh', ctx, params['wo'], precision=hp)
    f = jax.nn.relu(jnp.einsum('bsh,hf->bsf', h, params['w1'], precision=hp))
    f = jnp.einsum('bsf,fh->bsh', f, params['w2'], precision=hp)
    last = h + f
    hc = jax.nn.relu(last[:, 0, :])
    y = jnp.einsum('bh,hd->bd', hc, params['w_lin'], precision=hp) + params['b_lin']
    return y / jnp.linalg.norm(y, axis=1, keepdims=True)


def init_params(key):
    ks = jax.random.split(key, 9)
    scale = 0.1
    return {
        'embedding': scale * jax.random.normal(ks[0], (VOCAB, HIDDEN), jnp.float32),
        'wq': scale * jax.random.normal(ks[1], (HIDDEN, HIDDEN), jnp.float32),
        'wk': scale * jax.random.normal(ks[2], (HIDDEN, HIDDEN), jnp.float32),
        'wv': scale * jax.random.normal(ks[3], (HIDDEN, HIDDEN), jnp.float32),
        'wo': scale * jax.random.normal(ks[4], (HIDDEN, HIDDEN), jnp.float32),
        'w1': scale * jax.random.normal(ks[5], (HIDDEN, FFN), jnp.float32),
        'w2': scale * jax.random.normal(ks[6], (FFN, HIDDEN), jnp.float32),
        'w_lin': scale * jax.random.normal(ks[7], (HIDDEN, DIM), jnp.float32),
        'b_lin': scale * jax.random.normal(ks[8], (1, DIM), jnp.float32),
    }


if __name__ == "__main__":
    key = jax.random.PRNGKey(0)
    k_tok, k_param = jax.random.split(key)

    B, S = 2, 8
    tokens = jax.random.randint(k_tok, (B, S), 1, VOCAB).astype(jnp.int32)
    tokens = tokens.at[:, -2:].set(PAD_ID)             # trailing padding tokens

    params = init_params(k_param)

    out = rna_encoder_forward(tokens, params)
    out = jax.block_until_ready(out)

    ref = rna_encoder_ref(tokens, params)
    assert out.shape == (B, DIM)
    # outputs are unit-L2-normalized rows
    assert jnp.allclose(jnp.linalg.norm(out, axis=1), 1.0, atol=1e-3)
    assert jnp.allclose(out, ref, rtol=2e-2, atol=2e-2)

    print("KERNEL_OK")
</pallas_src>

<mosaic_0001>
module attributes {stable_mosaic.version = 11 : i64} {
  func.func @_rna_encoder_kernel(%arg0: i32, %arg1: memref<2x8xi32, #tpu.memory_space<vmem>>, %arg2: memref<16x32xf32, #tpu.memory_space<vmem>>, %arg3: memref<32x64xf32, #tpu.memory_space<vmem>>, %arg4: memref<32x64xf32, #tpu.memory_space<vmem>>, %arg5: memref<32x128xf32, #tpu.memory_space<vmem>>, %arg6: memref<128x32xf32, #tpu.memory_space<vmem>>, %arg7: memref<33x128xf32, #tpu.memory_space<vmem>>, %arg8: memref<2x128xf32, #tpu.memory_space<vmem>>) attributes {dimension_semantics = [#tpu.dimension_semantics<parallel>], iteration_bounds = array<i64: 1>, scalar_prefetch = 0 : i64, scratch_operands = 0 : i64, tpu.core_type = #tpu.core_type<tc>, window_params = [{transform_indices = @transform_0, window_bounds = array<i64: 2, 8>}, {pipeline_mode = #tpu.pipeline_mode<synchronous>, transform_indices = @transform_1, window_bounds = array<i64: 16, 32>}, {pipeline_mode = #tpu.pipeline_mode<synchronous>, transform_indices = @transform_2, window_bounds = array<i64: 32, 64>}, {pipeline_mode = #tpu.pipeline_mode<synchronous>, transform_indices = @transform_3, window_bounds = array<i64: 32, 64>}, {pipeline_mode = #tpu.pipeline_mode<synchronous>, transform_indices = @transform_4, window_bounds = array<i64: 32, 128>}, {pipeline_mode = #tpu.pipeline_mode<synchronous>, transform_indices = @transform_5, window_bounds = array<i64: 128, 32>}, {pipeline_mode = #tpu.pipeline_mode<synchronous>, transform_indices = @transform_6, window_bounds = array<i64: 33, 128>}, {transform_indices = @transform_7, window_bounds = array<i64: 2, 128>}]} {
    %c0 = arith.constant 0 : index
    %c0_0 = arith.constant 0 : index
    %0 = vector.load %arg1[%c0, %c0_0] : memref<2x8xi32, #tpu.memory_space<vmem>>, vector<2x8xi32>
    %c0_1 = arith.constant 0 : index
    %c0_2 = arith.constant 0 : index
    %1 = vector.load %arg2[%c0_1, %c0_2] : memref<16x32xf32, #tpu.memory_space<vmem>>, vector<16x32xf32>
    %2 = tpu.iota {dimensions = array<i32: 2>} : vector<2x8x16xi32>
    %3 = vector.shape_cast %0 : vector<2x8xi32> to vector<2x8x1xi32>
    %4 = vector.broadcast %3 : vector<2x8x1xi32> to vector<2x8x16xi32>
    %5 = arith.cmpi eq, %4, %2 : vector<2x8x16xi32>
    %6 = arith.extui %5 : vector<2x8x16xi1> to vector<2x8x16xi32>
    %7 = arith.sitofp %6 : vector<2x8x16xi32> to vector<2x8x16xf32>
    %8 = vector.shape_cast %7 : vector<2x8x16xf32> to vector<16x16xf32>
    %cst = arith.constant dense<0.000000e+00> : vector<16x32xf32>
    %9 = tpu.matmul %8, %1, %cst {dimension_numbers = #tpu.dot_dimension_numbers<[1], [0], [0], [1], [0, 0, 1, 1], [], []>} : vector<16x16xf32>, vector<16x32xf32>, vector<16x32xf32> -> vector<16x32xf32>
    %10 = tpu.iota {dimensions = array<i32: 1>} : vector<2x16xi32>
    %11 = vector.extract_strided_slice %0 {offsets = [0, 0], sizes = [2, 1], strides = [1, 1]} : vector<2x8xi32> to vector<2x1xi32>
    %12 = vector.broadcast %11 : vector<2x1xi32> to vector<2x16xi32>
    %13 = arith.cmpi eq, %12, %10 : vector<2x16xi32>
    %14 = arith.extui %13 : vector<2x16xi1> to vector<2x16xi32>
    %15 = arith.sitofp %14 : vector<2x16xi32> to vector<2x16xf32>
    %cst_3 = arith.constant dense<0.000000e+00> : vector<2x32xf32>
    %16 = tpu.matmul %15, %1, %cst_3 {dimension_numbers = #tpu.dot_dimension_numbers<[1], [0], [0], [1], [0, 0, 1, 1], [], []>} : vector<2x16xf32>, vector<16x32xf32>, vector<2x32xf32> -> vector<2x32xf32>
    %c0_4 = arith.constant 0 : index
    %c0_5 = arith.constant 0 : index
    %17 = vector.load %arg3[%c0_4, %c0_5] : memref<32x64xf32, #tpu.memory_space<vmem>>, vector<32x64xf32>
    %cst_6 = arith.constant dense<0.000000e+00> : vector<16x64xf32>
    %18 = tpu.matmul %9, %17, %cst_6 {dimension_numbers = #tpu.dot_dimension_numbers<[1], [0], [0], [1], [0, 0, 1, 1], [], []>} : vector<16x32xf32>, vector<32x64xf32>, vector<16x64xf32> -> vector<16x64xf32>
    %19 = vector.shape_cast %18 : vector<16x64xf32> to vector<2x8x64xf32>
    %20 = vector.extract_strided_slice %19 {offsets = [0, 0, 0], sizes = [2, 8, 32], strides = [1, 1, 1]} : vector<2x8x64xf32> to vector<2x8x32xf32>
    %21 = vector.extract_strided_slice %19 {offsets = [0, 0, 32], sizes = [2, 8, 32], strides = [1, 1, 1]} : vector<2x8x64xf32> to vector<2x8x32xf32>
    %c0_7 = arith.constant 0 : index
    %c0_8 = arith.constant 0 : index
    %22 = vector.load %arg4[%c0_7, %c0_8] : memref<32x64xf32, #tpu.memory_space<vmem>>, vector<32x64xf32>
    %23 = vector.extract_strided_slice %22 {offsets = [0, 0], sizes = [32, 32], strides = [1, 1]} : vector<32x64xf32> to vector<32x32xf32>
    %24 = vector.extract_strided_slice %22 {offsets = [0, 32], sizes = [32, 32], strides = [1, 1]} : vector<32x64xf32> to vector<32x32xf32>
    %cst_9 = arith.constant dense<0.000000e+00> : vector<2x32xf32>
    %25 = tpu.matmul %16, %23, %cst_9 {dimension_numbers = #tpu.dot_dimension_numbers<[1], [0], [0], [1], [0, 0, 1, 1], [], []>} : vector<2x32xf32>, vector<32x32xf32>, vector<2x32xf32> -> vector<2x32xf32>
    %c0_i32 = arith.constant 0 : i32
    %26 = vector.broadcast %c0_i32 : i32 to vector<2x8xi32>
    %27 = arith.cmpi ne, %0, %26 : vector<2x8xi32>
    %cst_10 = arith.constant 0.000000e+00 : f32
    %cst_11 = arith.constant -1.000000e+09 : f32
    %28 = vector.broadcast %cst_10 : f32 to vector<2x8xf32>
    %29 = vector.broadcast %cst_11 : f32 to vector<2x8xf32>
    %30 = arith.select %27, %28, %29 : vector<2x8xi1>, vector<2x8xf32>
    %31 = vector.shape_cast %25 : vector<2x32xf32> to vector<2x1x32xf32>
    "tpu.trace_start"() <{level = 10 : i32, message = "bqh,bsh->bqs"}> : () -> ()
    %cst_12 = arith.constant dense<0.000000e+00> : vector<2x1x8xf32>
    %32 = tpu.matmul %31, %20, %cst_12 {dimension_numbers = #tpu.dot_dimension_numbers<[2], [2], [1], [1], [0, 0, 0, 1, 1, 1], [0], [0]>} : vector<2x1x32xf32>, vector<2x8x32xf32>, vector<2x1x8xf32> -> vector<2x1x8xf32>
    "tpu.trace_stop"() : () -> ()
    %cst_13 = arith.constant 0.176776692 : f32
    %33 = vector.broadcast %cst_13 : f32 to vector<2x1x8xf32>
    %34 = arith.mulf %32, %33 : vector<2x1x8xf32>
    %35 = vector.shape_cast %30 : vector<2x8xf32> to vector<2x1x8xf32>
    %36 = arith.addf %34, %35 : vector<2x1x8xf32>
    %cst_14 = arith.constant dense<0xFF800000> : vector<2x1xf32>
    %37 = vector.multi_reduction <maximumf>, %36, %cst_14 [2] : vector<2x1x8xf32> to vector<2x1xf32>
    %38 = vector.shape_cast %37 : vector<2x1xf32> to vector<2x1x1xf32>
    %39 = vector.broadcast %38 : vector<2x1x1xf32> to vector<2x1x8xf32>
    %40 = arith.subf %36, %39 : vector<2x1x8xf32>
    %41 = math.exp %40 : vector<2x1x8xf32>
    %cst_15 = arith.constant dense<0.000000e+00> : vector<2x1xf32>
    %42 = vector.multi_reduction <add>, %41, %cst_15 [2] : vector<2x1x8xf32> to vector<2x1xf32>
    %43 = vector.shape_cast %42 : vector<2x1xf32> to vector<2x1x1xf32>
    %44 = tpu.reciprocal %43 {approx = true} : vector<2x1x1xf32> -> vector<2x1x1xf32>
    %45 = vector.broadcast %44 : vector<2x1x1xf32> to vector<2x1x8xf32>
    %46 = arith.mulf %41, %45 : vector<2x1x8xf32>
    "tpu.trace_start"() <{level = 10 : i32, message = "bqs,bsh->bqh"}> : () -> ()
    %cst_16 = arith.constant dense<0.000000e+00> : vector<2x1x32xf32>
    %47 = tpu.matmul %46, %21, %cst_16 {dimension_numbers = #tpu.dot_dimension_numbers<[2], [1], [1], [2], [0, 0, 0, 1, 1, 2], [0], [0]>} : vector<2x1x8xf32>, vector<2x8x32xf32>, vector<2x1x32xf32> -> vector<2x1x32xf32>
    "tpu.trace_stop"() : () -> ()
    %48 = vector.shape_cast %47 : vector<2x1x32xf32> to vector<2x32xf32>
    %cst_17 = arith.constant dense<0.000000e+00> : vector<2x32xf32>
    %49 = tpu.matmul %48, %24, %cst_17 {dimension_numbers = #tpu.dot_dimension_numbers<[1], [0], [0], [1], [0, 0, 1, 1], [], []>} : vector<2x32xf32>, vector<32x32xf32>, vector<2x32xf32> -> vector<2x32xf32>
    %50 = arith.addf %16, %49 : vector<2x32xf32>
    %c0_18 = arith.constant 0 : index
    %c0_19 = arith.constant 0 : index
    %51 = vector.load %arg5[%c0_18, %c0_19] : memref<32x128xf32, #tpu.memory_space<vmem>>, vector<32x128xf32>
    %cst_20 = arith.constant dense<0.000000e+00> : vector<2x128xf32>
    %52 = tpu.matmul %50, %51, %cst_20 {dimension_numbers = #tpu.dot_dimension_numbers<[1], [0], [0], [1], [0, 0, 1, 1], [], []>} : vector<2x32xf32>, vector<32x128xf32>, vector<2x128xf32> -> vector<2x128xf32>
    %cst_21 = arith.constant 0.000000e+00 : f32
    %53 = vector.broadcast %cst_21 : f32 to vector<2x128xf32>
    %54 = arith.maximumf %52, %53 : vector<2x128xf32>
    %c0_22 = arith.constant 0 : index
    %c0_23 = arith.constant 0 : index
    %55 = vector.load %arg6[%c0_22, %c0_23] : memref<128x32xf32, #tpu.memory_space<vmem>>, vector<128x32xf32>
    %cst_24 = arith.constant dense<0.000000e+00> : vector<2x32xf32>
    %56 = tpu.matmul %54, %55, %cst_24 {dimension_numbers = #tpu.dot_dimension_numbers<[1], [0], [0], [1], [0, 0, 1, 1], [], []>} : vector<2x128xf32>, vector<128x32xf32>, vector<2x32xf32> -> vector<2x32xf32>
    %57 = arith.addf %50, %56 : vector<2x32xf32>
    %c0_25 = arith.constant 0 : index
    %c0_26 = arith.constant 0 : index
    %58 = vector.load %arg7[%c0_25, %c0_26] : memref<33x128xf32, #tpu.memory_space<vmem>>, vector<33x128xf32>
    %59 = vector.extract_strided_slice %58 {offsets = [0, 0], sizes = [32, 128], strides = [1, 1]} : vector<33x128xf32> to vector<32x128xf32>
    %60 = vector.extract_strided_slice %58 {offsets = [32, 0], sizes = [1, 128], strides = [1, 1]} : vector<33x128xf32> to vector<1x128xf32>
    %cst_27 = arith.constant 0.000000e+00 : f32
    %61 = vector.broadcast %cst_27 : f32 to vector<2x32xf32>
    %62 = arith.maximumf %57, %61 : vector<2x32xf32>
    %cst_28 = arith.constant dense<0.000000e+00> : vector<2x128xf32>
    %63 = tpu.matmul %62, %59, %cst_28 {dimension_numbers = #tpu.dot_dimension_numbers<[1], [0], [0], [1], [0, 0, 1, 1], [], []>} : vector<2x32xf32>, vector<32x128xf32>, vector<2x128xf32> -> vector<2x128xf32>
    %64 = vector.broadcast %60 : vector<1x128xf32> to vector<2x128xf32>
    %65 = arith.addf %63, %64 : vector<2x128xf32>
    %66 = arith.mulf %65, %65 : vector<2x128xf32>
    %cst_29 = arith.constant dense<0.000000e+00> : vector<2xf32>
    %67 = vector.multi_reduction <add>, %66, %cst_29 [1] : vector<2x128xf32> to vector<2xf32>
    %68 = vector.shape_cast %67 : vector<2xf32> to vector<2x1xf32>
    %cst_30 = arith.constant 1.000000e-24 : f32
    %69 = vector.broadcast %cst_30 : f32 to vector<2x1xf32>
    %70 = arith.maximumf %68, %69 : vector<2x1xf32>
    %71 = math.rsqrt %70 : vector<2x1xf32>
    %72 = vector.broadcast %71 : vector<2x1xf32> to vector<2x128xf32>
    %73 = arith.mulf %65, %72 : vector<2x128xf32>
    %c0_31 = arith.constant 0 : index
    %c0_32 = arith.constant 0 : index
    %74 = vector.load %arg8[%c0_31, %c0_32] : memref<2x128xf32, #tpu.memory_space<vmem>>, vector<2x128xf32>
    tpu.vector_store %arg8[%c0_31, %c0_32], %73 {strides = array<i32>} : memref<2x128xf32, #tpu.memory_space<vmem>>, vector<2x128xf32>,
    return
  }
  func.func @transform_0(%arg0: i32) -> (i32, i32) {
    %c0_i32 = arith.constant 0 : i32
    %c0_i32_0 = arith.constant 0 : i32
    return %arg0, %c0_i32 : i32, i32
  }
  func.func @transform_1(%arg0: i32) -> (i32, i32) {
    %c0_i32 = arith.constant 0 : i32
    %c0_i32_0 = arith.constant 0 : i32
    %c0_i32_1 = arith.constant 0 : i32
    return %c0_i32, %c0_i32_0 : i32, i32
  }
  func.func @transform_2(%arg0: i32) -> (i32, i32) {
    %c0_i32 = arith.constant 0 : i32
    %c0_i32_0 = arith.constant 0 : i32
    %c0_i32_1 = arith.constant 0 : i32
    return %c0_i32, %c0_i32_0 : i32, i32
  }
  func.func @transform_3(%arg0: i32) -> (i32, i32) {
    %c0_i32 = arith.constant 0 : i32
    %c0_i32_0 = arith.constant 0 : i32
    %c0_i32_1 = arith.constant 0 : i32
    return %c0_i32, %c0_i32_0 : i32, i32
  }
  func.func @transform_4(%arg0: i32) -> (i32, i32) {
    %c0_i32 = arith.constant 0 : i32
    %c0_i32_0 = arith.constant 0 : i32
    %c0_i32_1 = arith.constant 0 : i32
    return %c0_i32, %c0_i32_0 : i32, i32
  }
  func.func @transform_5(%arg0: i32) -> (i32, i32) {
    %c0_i32 = arith.constant 0 : i32
    %c0_i32_0 = arith.constant 0 : i32
    %c0_i32_1 = arith.constant 0 : i32
    return %c0_i32, %c0_i32_0 : i32, i32
  }
  func.func @transform_6(%arg0: i32) -> (i32, i32) {
    %c0_i32 = arith.constant 0 : i32
    %c0_i32_0 = arith.constant 0 : i32
    %c0_i32_1 = arith.constant 0 : i32
    return %c0_i32, %c0_i32_0 : i32, i32
  }
  func.func @transform_7(%arg0: i32) -> (i32, i32) {
    %c0_i32 = arith.constant 0 : i32
    %c0_i32_0 = arith.constant 0 : i32
    return %arg0, %c0_i32 : i32, i32
  }
}

</mosaic_0001>

<bundles_post_ra>
// kernel: tpu_custom_call.1
= control target key start
LH: loop header
LB: loop body
LE: loop exit
PB: predicated region body
PF: predicated region fallthrough
CT: control target
= control target key end

     0   :  { %v30_v1 = vlaneseq  ;;  %v1439_v3 = vmov 0   ;;  %s1699_s0 = inlined_call_operand.vmem [shape: s32[2,8], index: 0, kind: input, shape index: {}]   ;;  %s1700_s1 = inlined_call_operand.vmem [shape: f32[16,32], index: 1, kind: input, shape index: {}]   ;;  %s1701_s2 = inlined_call_operand.vmem [shape: f32[32,64], index: 2, kind: input, shape index: {}]   ;;  %s1702_s3 = inlined_call_operand.vmem [shape: f32[32,64], index: 3, kind: input, shape index: {}]   ;;  %s1703_s4 = inlined_call_operand.vmem [shape: f32[32,128], index: 4, kind: input, shape index: {}]   ;;  %s1704_s5 = inlined_call_operand.vmem [shape: f32[128,32], index: 5, kind: input, shape index: {}]   ;;  %s1705_s6 = inlined_call_operand.vmem [shape: f32[33,128], index: 6, kind: input, shape index: {}]   ;;  %s1706_s7 = inlined_call_operand.hbm [shape: f32[2,128], index: 7, kind: output, shape index: {}]  }
   0x1   :  { %v1490_v0 = vld [vmem:[%s1699_s0] sm:$0x3]  ;;  %1393 = vset.pattern.permute.xlu1 %v1439_v3  ;;  %v29_v4 = vld [vmem:[%s1700_s1 + $0x8] sm:$0xff]  ;;  %1404 = vset.pattern.permute.xlu0 %v1439_v3 }
   0x2   :  { %v28_v2 = vld [vmem:[%s1700_s1] sm:$0xff] }
   0x3   :  { %12 = vsyncpa [#allocation3], 0  ;;  %135 = vperm.xlu1 %1393, %v1490_v0   ;;  %v1499_v5 = vshrl.u32 %v30_v1, 7  ;;  %v1322_v6 = vpack.c.bf16 %v29_v4, %v28_v2  ;;  %v1440_v7 = vmov 0.0   ;;  %vm1441_vm0 = vmmov 0   ;;  %v213_v16 = vld [vmem:[%s1701_s2] sm:$0xff] }
   0x4   :  { %1234 = vmatprep.subr.mxu0 %v1440_v7  ;;  %1236 = vmatprep.mubr.msk.f32.mxu0 %vm1441_vm0, %v1440_v7  ;;  %v1442_v11 = vmov 0.0|0.0   ;;  %v31_v13 = vand.u32 127, %v30_v1  ;;  %vm52_vm1 = vcmask 130048   ;;  %v214_v17 = vld [vmem:[%s1701_s2 + $0x8] sm:$0xff]  ;;  %v215_v21 = vld [vmem:[%s1701_s2 + $0x10] sm:$0xff]  ;;  %v216_v22 = vld [vmem:[%s1701_s2 + $0x18] sm:$0xff] }
   0x5   :  { %v34_v8 = vsub.s32 0, %v1499_v5  ;;  %v41_v9 = vsub.s32 1, %v1499_v5  ;;  %1323 = vmatprep.subr.bf16.mxu1 %v1322_v6  ;;  %v1329_v19 = vpack.c.bf16 %v214_v17, %v213_v16  ;;  %v1333_v25 = vpack.c.bf16 %v216_v22, %v215_v21  ;;  %v1533_v26 = vld [vmem:[%s1702_s3] sm:$0xff]  ;;  %v1538_v27 = vld [vmem:[%s1702_s3 + $0x8] sm:$0xff]  ;;  %v1545_v31 = vld [vmem:[%s1702_s3 + $0x10] sm:$0xff]  ;;  %s1446_s14 = smov [#allocation2]  }
   0x6   :  { %1325 = vmatpush3.bf16.msra.mxu1 %v1322_v6  ;;  %vm217_vm5 = vcmask 261120   ;;  %v1338_v29 = vpack.c.bf16 %v1538_v27, %v1533_v26  ;;  %v1550_v32 = vld [vmem:[%s1702_s3 + $0x18] sm:$0xff]  ;;  %v1443_v36 = vmov 1966171168   ;;  %vm376_vm6 = vcmp.ne.s32.totalorder %v1490_v0, 0  ;;  %s1445_s3 = smov 96  }
   0x7   :  { %v35_v10 = vrot.slane %v1490_v0, %v34_v8  ;;  %1326 = vmatprep.subr.bf16.mxu1 %v1442_v11  ;;  %v42_v12 = vrot.slane %v1490_v0, %v41_v9  ;;  %v1341_v33 = vpack.c.bf16 %v1550_v32, %v1545_v31  ;;  %v380_v37 = vunpack.c.l.s4 %v1443_v36  ;;  %s1113_s15 = sshll.u32 %s1446_s14, 4  ;;  %s1114_s15 = int_to_ptr.vmem [resolvable:$true] %s1113_s15 }
   0x8   :  { %v1444_v48 = vmov -1e+09   ;;  %vm580_vm7 = vcmask 57344   ;;  %vm606_vm8 = vcmask 64512   ;;  %vm759_vm9 = vcmask 1041409   ;;  %s1415_s16 = scalar_lea.vmem %s1114_s15, 32  ;;  %p1420_p1 = scmp.lt.s32.totalorder %s1114_s15, %s1114_s15 }
   0x9   :  { %37 = vbcast.lane.b32.xlu0 %v35_v10, 256  ;;  %v381_v39 = vunpack.c.0.s8 %v380_v37  ;;  %v377_v49 = vsel %vm376_vm6, 0.0, %v1444_v48  ;;  %vm1099_vm10 = vcmask 1041408   ;;  %p1416_p0 = scmp.ne.s32.totalorder %s1114_s15, %s1415_s16  ;;  %p1421_p2 = scmp.lt.s32.totalorder %s1415_s16, %s1415_s16 }
   0xb   :  { %v384_v41 = vsub.s32 %v381_v39, %v1499_v5  ;;  %p1422_p3 = por %p1421_p2, %p1420_p1 }
   0xd   :  { %44 = vbcast.lane.b32.xlu0 %v42_v12, 256  ;;  %v560_v50 = vrot.slane %v377_v49, %v384_v41  ;;  %v1394_v12 = vpack.i.bf16 %v1538_v27, %v1533_v26  ;;  %v932_v49 = vld [vmem:[%s1704_s5 + $0x20] sm:$0xff]  ;;  %p1423_p4 = pnand %p1422_p3, %p1416_p0 }
   0xf   :  { %v561_v51 = vcombine.high %v560_v50, %v560_v50  ;;  %v568_v52 = vrot.slane %v560_v50, %v384_v41  ;;  %v933_v50 = vld [vmem:[%s1704_s5 + $0x28] sm:$0xff] }
  0x11   :  { %v575_v56 = vrot.slane %v561_v51, %v384_v41  ;;  %v1362_v51 = vpack.c.bf16 %v933_v50, %v932_v49 }
  0x7b   :  { %v38_v14 = vpop.permute.xlu0 %37 }
  0x7c   :  { %vm46_vm2 = vcmp.eq.s32.totalorder %v38_v14, %v31_v13 }
  0x7d   :  { %v1121_v15 = vsel %vm46_vm2, 1.0, %v1440_v7 }
  0x7e   :  { %1202 = vmatprep.mubr.msk.f32.mxu1 %vm52_vm1, %v1121_v15 }
  0x7f   :  { %v45_v18 = vpop.permute.xlu0 %44 }
  0x80   :  { %vm47_vm3 = vcmp.eq.s32.totalorder %v45_v18, %v31_v13 }
  0x81   :  { %v1122_v20 = vsel %vm47_vm3, 1.0, %v1440_v7 }
  0x82   :  { %1203 = vmatmul.mubr.msk.f32.vlgmr.msra.gmra.mrb[0].mxu1 %vm52_vm1, %v1122_v20  ;;  %v136_v23 = vpop.permute.xlu1 %135 }
  0x83   :  { %vm137_vm4 = vcmp.eq.s32.totalorder %v136_v23, %v31_v13  ;;  %1328 = vmatpush3.bf16.msra.mxu1 %v1322_v6  ;;  %1209 = vmatprep.mubr.msk.f32.mxu1 %vm1441_vm0, %v1440_v7  ;;  %v1399_v13 = vpack.i.bf16 %v1550_v32, %v1545_v31  ;;  %v851_v31 = vld [vmem:[%s1703_s4 + $0x8] sm:$0xff] }
  0x84   :  { %v1125_v24 = vsel %vm137_vm4, 1.0, %v1440_v7  ;;  %1330 = vmatprep.subr.bf16.mxu1 %v1329_v19 }
  0x86   :  { %1210 = vmatmul.mubr.msk.f32.vlgmr.msra.gmra.mrb[2].mxu1 %vm52_vm1, %v1125_v24 }
  0x87   :  { %1332 = vmatpush3.bf16.msra.mxu1 %v1329_v19 }
  0x88   :  { %1334 = vmatprep.subr.bf16.mxu1 %v1333_v25 }
  0x8b   :  { %1336 = vmatpush3.bf16.msra.mxu1 %v1333_v25 }
  0x8c   :  { %1337 = vmatprep.subr.bf16.mxu1 %v1442_v11 }
 0x155   :  { %v1204_v28 = vpop.f32.mrb[0].mxu1 }
 0x156   :  { %v125_v30 = vpop.f32.mrb[1].mxu1 }
 0x157   :  { %1220 = vmatprep.mubr.msk.f32.mxu1 %vm217_vm5, %v125_v30  ;;  %v850_v30 = vld [vmem:[%s1703_s4] sm:$0xff] }
 0x158   :  { %1221 = vmatmul.mubr.msk.f32.vlgmr.msra.gmra.mrb[4].mxu1 %vm217_vm5, %v1204_v28  ;;  %v1350_v32 = vpack.c.bf16 %v851_v31, %v850_v30 }
 0x159   :  { %1339 = vmatpush3.bf16.msra.mxu1 %v1338_v29  ;;  %v1556_v34 = vpop.f32.mrb[2].mxu1  ;;  %1231 = vmatprep.mubr.msk.f32.mxu1 %vm1441_vm0, %v1440_v7 }
 0x15a   :  { %1340 = vmatprep.subr.bf16.mxu1 %v1442_v11  ;;  %v1211_v35 = vpop.f32.mrb[3].mxu1 }
 0x15d   :  { %1342 = vmatpush3.bf16.msra.mxu1 %v1341_v33 }
 0x15e   :  { %1239 = vmatprep.subr.mxu1 %v1440_v7 }
 0x160   :  { %1232 = vmatmul.mubr.msk.f32.vlgmr.msra.gmra.mrb[6].mxu1 %vm217_vm5, %v1556_v34 }
 0x161   :  { %1241 = vmatprep.mubr.msk.f32.mxu1 %vm1441_vm0, %v1440_v7 }
 0x22b   :  { %v1222_v38 = vpop.f32.mrb[4].mxu1 }
 0x22c   :  { %v290_v40 = vpop.f32.mrb[5].mxu1  ;;  %1240 = vmatpush3.xpose.msk.msra.mxu1 %vm217_vm5, %v1222_v38 }
 0x22d   :  { %1235 = vmatpush3.xpose.msk.msra.mxu0 %vm217_vm5, %v290_v40  ;;  %1249 = vmatprep.subr.mxu1 %v1440_v7 }
 0x22e   :  { %1244 = vmatprep.subr.mxu0 %v1440_v7 }
 0x233   :  { %v372_v42 = vpop.f32.mrb[6].mxu1 }
 0x234   :  { %v385_v43 = vrot.slane %v372_v42, %v384_v41  ;;  %v1233_v44 = vpop.f32.mrb[7].mxu1 }
 0x235   :  { %v929_v44 = vld [vmem:[%s1704_s5 + $0x8] sm:$0xff] }
 0x236   :  { %v386_v45 = vcombine.high %v385_v43, %v385_v43  ;;  %v393_v46 = vrot.slane %v385_v43, %v384_v41  ;;  %v928_v43 = vld [vmem:[%s1704_s5] sm:$0xff] }
 0x238   :  { %v400_v47 = vrot.slane %v386_v45, %v384_v41  ;;  %1237 = vmatmul.mubr.msk.f32.vlgmr.msra.gmra.mrb[0].mxu0 %vm217_vm5, %v393_v46  ;;  %v853_v41 = vld [vmem:[%s1703_s4 + $0x18] sm:$0xff]  ;;  %v930_v45 = vld [vmem:[%s1704_s5 + $0x10] sm:$0xff]  ;;  %v1356_v46 = vpack.c.bf16 %v929_v44, %v928_v43 }
 0x239   :  { %1246 = vmatprep.mubr.msk.f32.mxu0 %vm1441_vm0, %v1440_v7 }
 0x23a   :  { %1242 = vmatmul.mubr.msk.f32.vlgmr.msra.gmra.mrb[8].mxu1 %vm217_vm5, %v400_v47  ;;  %v931_v47 = vld [vmem:[%s1704_s5 + $0x18] sm:$0xff] }
 0x23b   :  { %1251 = vmatprep.mubr.msk.f32.mxu1 %vm1441_vm0, %v1440_v7  ;;  %v1359_v48 = vpack.c.bf16 %v931_v47, %v930_v45 }
 0x30b   :  { %v472_v53 = vpop.f32.mrb[0].mxu0 }
 0x30c   :  { %v551_v54 = vmul.f32 0.17677669, %v472_v53  ;;  %v1238_v55 = vpop.f32.mrb[1].mxu0  ;;  %v935_v53 = vld [vmem:[%s1704_s5 + $0x38] sm:$0xff] }
 0x30d   :  { %v547_v57 = vpop.f32.mrb[8].mxu1  ;;  %v936_v55 = vld [vmem:[%s1704_s5 + $0x40] sm:$0xff] }
 0x30e   :  { %v552_v58 = vmul.f32 0.17677669, %v547_v57  ;;  %v1243_v59 = vpop.f32.mrb[9].mxu1  ;;  %v578_v60 = vadd.f32 %v568_v52, %v551_v54  ;;  %v934_v52 = vld [vmem:[%s1704_s5 + $0x30] sm:$0xff] }
 0x30f   :  { %v1365_v54 = vpack.c.bf16 %v935_v53, %v934_v52  ;;  %v939_v59 = vld [vmem:[%s1704_s5 + $0x58] sm:$0xff] }
 0x310   :  { %v581_v61 = vsel %vm580_vm7, %v578_v60, -inf  ;;  %v579_v62 = vadd.f32 %v575_v56, %v552_v58  ;;  %v937_v56 = vld [vmem:[%s1704_s5 + $0x48] sm:$0xff]  ;;  %v938_v58 = vld [vmem:[%s1704_s5 + $0x50] sm:$0xff] }
 0x311   :  { %582 = vmax.xlane.f32.xlu0 %v581_v61  ;;  %v1368_v57 = vpack.c.bf16 %v937_v56, %v936_v55  ;;  %v940_v61 = vld [vmem:[%s1704_s5 + $0x60] sm:$0xff] }
 0x312   :  { %v584_v63 = vsel %vm580_vm7, %v579_v62, -inf }
 0x313   :  { %585 = vmax.xlane.f32.xlu1 %v584_v63 }
 0x39e   :  { %v583_v0 = vpop.xlane.xlu0 %582 }
 0x39f   :  { %v587_v1 = vsub.f32 %v578_v60, %v583_v0  ;;  %v1371_v60 = vpack.c.bf16 %v939_v59, %v938_v58 }
 0x3a0   :  { %v586_v2 = vpop.xlane.xlu1 %585 }
 0x3a1   :  { %v589_v3 = vmul.f32 1.442695, %v587_v1  ;;  %v588_v4 = vsub.f32 %v579_v62, %v586_v2  ;;  %v941_v62 = vld [vmem:[%s1704_s5 + $0x68] sm:$0xff] }
 0x3a2   :  { %v1374_v63 = vpack.c.bf16 %v941_v62, %v940_v61 }
 0x3a3   :  { %1405 = vpow2.f32 %v589_v3  ;;  %v591_v5 = vmul.f32 1.442695, %v588_v4  ;;  %v942_v3 = vld [vmem:[%s1704_s5 + $0x70] sm:$0xff]  ;;  %v943_v4 = vld [vmem:[%s1704_s5 + $0x78] sm:$0xff] }
 0x3a5   :  { %1407 = vpow2.f32 %v591_v5  ;;  %v1377_v5 = vpack.c.bf16 %v943_v4, %v942_v3 }
 0x3ad   :  { %v1406_v6 = vpop.eup %1405 }
 0x3ae   :  { %v593_v8 = vsel %vm580_vm7, %v1406_v6, 0.0 }
 0x3af   :  { %v1408_v9 = vpop.eup %1407  ;;  %594 = vadd.xlane.f32.xlu1 %v593_v8 }
 0x3b0   :  { %v596_v10 = vsel %vm580_vm7, %v1408_v9, 0.0 }
 0x3b1   :  { %597 = vadd.xlane.f32.xlu0 %v596_v10 }
 0x3c0   :  { %603 = vrot.lane.b32.xlu1 %v290_v40, %s1445_s3  ;;  %v852_v40 = vld [vmem:[%s1703_s4 + $0x10] sm:$0xff] }
 0x3c1   :  { %v1353_v42 = vpack.c.bf16 %v853_v41, %v852_v40 }
 0x3c4   :  { %1395 = vrot.lane.b32.xlu1 %v1394_v12, %s1445_s3  ;;  %v1017_v12 = vld [vmem:[%s1705_s6 + $0x10] sm:$0xff] }
 0x3c7   :  { %680 = vrot.lane.b32.xlu0 %v1222_v38, %s1445_s3 }
 0x3cb   :  { %1400 = vrot.lane.b32.xlu0 %v1399_v13, %s1445_s3  ;;  %v1018_v13 = vld [vmem:[%s1705_s6 + $0x18] sm:$0xff] }
 0x43c   :  { %v595_v14 = vpop.xlane.xlu1 %594 }
 0x43d   :  { %1409 = vrcp.f32 %v595_v14  ;;  %v1383_v14 = vpack.c.bf16 %v1018_v13, %v1017_v12 }
 0x43e   :  { %v598_v15 = vpop.xlane.xlu0 %597 }
 0x43f   :  { %1411 = vrcp.f32 %v598_v15 }
 0x440   :  { %v604_v16 = vpop.permute.xlu1 %603 }
 0x441   :  { %1245 = vmatpush3.msra.mxu0 %v604_v16 }
 0x442   :  { %v681_v17 = vpop.permute.xlu0 %680  ;;  %1343 = vmatprep.subr.bf16.mxu0 %v1442_v11 }
 0x443   :  { %1250 = vmatpush3.msra.mxu1 %v681_v17 }
 0x444   :  { %v1396_v18 = vpop.permute.xlu1 %1395  ;;  %1349 = vmatprep.subr.bf16.mxu1 %v1442_v11 }
 0x445   :  { %v1398_v19 = vunpack.i.h.bf16 %v1396_v18  ;;  %v1397_v20 = vunpack.i.l.bf16 %v1396_v18 }
 0x446   :  { %v1401_v21 = vpop.permute.xlu0 %1400 }
 0x447   :  { %v1410_v22 = vpop.eup %1409  ;;  %v1344_v23 = vpack.c.bf16 %v1398_v19, %v1397_v20  ;;  %v1403_v24 = vunpack.i.h.bf16 %v1401_v21  ;;  %v1402_v25 = vunpack.i.l.bf16 %v1401_v21 }
 0x448   :  { %v601_v26 = vmul.f32 %v1410_v22, %v1406_v6  ;;  %v1016_v6 = vld [vmem:[%s1705_s6 + $0x8] sm:$0xff] }
 0x449   :  { %v1412_v27 = vpop.eup %1411  ;;  %v1347_v29 = vpack.c.bf16 %v1403_v24, %v1402_v25 }
 0x44a   :  { %v602_v28 = vmul.f32 %v1412_v27, %v1408_v9  ;;  %1247 = vmatmul.mubr.msk.f32.vlgmr.msra.gmra.mrb[2].mxu0 %vm606_vm8, %v601_v26 }
 0x44b   :  { %1345 = vmatpush3.bf16.msra.mxu0 %v1344_v23  ;;  %1262 = vmatprep.mubr.msk.f32.mxu0 %vm1441_vm0, %v1440_v7 }
 0x44c   :  { %1252 = vmatmul.mubr.msk.f32.vlgmr.msra.gmra.mrb[10].mxu1 %vm606_vm8, %v602_v28  ;;  %1346 = vmatprep.subr.bf16.mxu0 %v1442_v11 }
 0x44d   :  { %1273 = vmatprep.mubr.msk.f32.mxu1 %vm1441_vm0, %v1440_v7  ;;  %1351 = vmatpush3.bf16.msra.mxu1 %v1350_v32 }
 0x44e   :  { %1352 = vmatprep.subr.bf16.mxu1 %v1442_v11 }
 0x44f   :  { %1348 = vmatpush3.bf16.msra.mxu0 %v1347_v29 }
 0x450   :  { %1355 = vmatprep.subr.bf16.mxu0 %v1442_v11 }
 0x451   :  { %1354 = vmatpush3.bf16.msra.mxu1 %v1353_v42 }
 0x452   :  { %1379 = vmatprep.subr.bf16.mxu1 %v1442_v11 }
 0x51d   :  { %v676_v33 = vpop.f32.mrb[2].mxu0 }
 0x51e   :  { %v1248_v35 = vpop.f32.mrb[3].mxu0 }
 0x51f   :  { %v752_v36 = vpop.f32.mrb[10].mxu1 }
 0x520   :  { %v758_v37 = vrot.slane %v752_v36, 7  ;;  %v1253_v38 = vpop.f32.mrb[11].mxu1 }
 0x522   :  { %v760_v39 = vsel %vm759_vm9, %v758_v37, %v676_v33 }
 0x523   :  { %1263 = vmatmul.mubr.msk.f32.vlgmr.msra.gmra.mrb[4].mxu0 %vm217_vm5, %v760_v39 }
 0x524   :  { %1308 = vmatprep.mubr.msk.f32.mxu0 %vm1441_vm0, %v1440_v7  ;;  %1357 = vmatpush3.bf16.msra.mxu0 %v1356_v46 }
 0x525   :  { %1358 = vmatprep.subr.bf16.mxu0 %v1442_v11 }
 0x528   :  { %1360 = vmatpush3.bf16.msra.mxu0 %v1359_v48 }
 0x529   :  { %1361 = vmatprep.subr.bf16.mxu0 %v1442_v11 }
 0x52c   :  { %1363 = vmatpush3.bf16.msra.mxu0 %v1362_v51 }
 0x52d   :  { %1364 = vmatprep.subr.bf16.mxu0 %v1442_v11 }
 0x530   :  { %1366 = vmatpush3.bf16.msra.mxu0 %v1365_v54 }
 0x531   :  { %1367 = vmatprep.subr.bf16.mxu0 %v1442_v11 }
 0x534   :  { %1369 = vmatpush3.bf16.msra.mxu0 %v1368_v57 }
 0x535   :  { %1370 = vmatprep.subr.bf16.mxu0 %v1442_v11 }
 0x538   :  { %1372 = vmatpush3.bf16.msra.mxu0 %v1371_v60 }
 0x539   :  { %1373 = vmatprep.subr.bf16.mxu0 %v1442_v11 }
 0x53c   :  { %1375 = vmatpush3.bf16.msra.mxu0 %v1374_v63 }
 0x53d   :  { %1376 = vmatprep.subr.bf16.mxu0 %v1442_v11 }
 0x540   :  { %1378 = vmatpush3.bf16.msra.mxu0 %v1377_v5 }
 0x5f6   :  { %v845_v0 = vpop.f32.mrb[4].mxu0 }
 0x5f7   :  { %v849_v1 = vadd.f32 %v845_v0, %v1556_v34  ;;  %v1264_v2 = vpop.f32.mrb[5].mxu0  ;;  %v1015_v34 = vld [vmem:[%s1705_s6] sm:$0xff] }
 0x5f8   :  { %v1380_v8 = vpack.c.bf16 %v1016_v6, %v1015_v34 }
 0x5f9   :  { %1274 = vmatmul.mubr.msk.f32.vlgmr.msra.gmra.mrb[12].mxu1 %vm217_vm5, %v849_v1 }
 0x5fa   :  { %1319 = vmatprep.mubr.msk.f32.mxu1 %vm1441_vm0, %v1440_v7  ;;  %1381 = vmatpush3.bf16.msra.mxu1 %v1380_v8 }
 0x5fb   :  { %1382 = vmatprep.subr.bf16.mxu1 %v1442_v11  ;;  %v1138_v11 = vld [vmem:[%s1705_s6 + $0x20] ss:$0 sm:$0xff] }
 0x5fe   :  { %1384 = vmatpush3.bf16.msra.mxu1 %v1383_v14 }
 0x6cc   :  { %v923_v7 = vpop.f32.mrb[12].mxu1 }
 0x6cd   :  { %v927_v9 = vmax.f32 %v923_v7, 0.0  ;;  %v1275_v10 = vpop.f32.mrb[13].mxu1 }
 0x6cf   :  { %1309 = vmatmul.mubr.f32.vlgmr.msra.gmra.mrb[6].mxu0 %v927_v9 }
 0x7a2   :  { %v1010_v15 = vpop.f32.mrb[6].mxu0 }
 0x7a3   :  { %v1014_v16 = vadd.f32 %v1010_v15, %v849_v1  ;;  %v1310_v17 = vpop.f32.mrb[7].mxu0 }
 0x7a5   :  { %v1020_v18 = vmax.f32 %v1014_v16, 0.0 }
 0x7a7   :  { %1320 = vmatmul.mubr.msk.f32.vlgmr.msra.gmra.mrb[14].mxu1 %vm217_vm5, %v1020_v18 }
 0x87a   :  { %v1094_v19 = vpop.f32.mrb[14].mxu1 }
 0x87b   :  { %v1095_v20 = vadd.f32 %v1138_v11, %v1094_v19  ;;  %v1321_v21 = vpop.f32.mrb[15].mxu1 }
 0x87d   :  { %v1098_v22 = vmul.f32 %v1095_v20, %v1095_v20 }
 0x87f   :  { %v1100_v23 = vsel %vm1099_vm10, %v1098_v22, 0.0 }
 0x880   :  { %1101 = vadd.xlane.f32.xlu1 %v1100_v23 }
 0x90d   :  { %v1102_v24 = vpop.xlane.xlu1 %1101 }
 0x90e   :  { %v1103_v25 = vmax.f32 %v1102_v24, 1e-24 }
 0x910   :  { %1413 = vrsqrt.f32 %v1103_v25 }
 0x91a   :  { %v1414_v26 = vpop.eup %1413 }
 0x91b   :  { %v1105_v27 = vmul.f32 %v1414_v26, %v1095_v20 }
 0x91d   :  { %1106 = vst [vmem:[#allocation2] sm:$0x3] %v1105_v27 }
 0x91e   :  { %1426 = shalt.err (!%p1423_p4)
}
 0x91f   :  { %s1427_s18 = scalar_lea.hbm %s1706_s7, 32 }
 0x920   :  { %p1428_p5 = scmp.ne.s32.totalorder %s1706_s7, %s1427_s18  ;;  %p1431_p6 = scmp.lt.u32.totalorder %s1427_s18, %s1706_s7 }
 0x922   :  { %p1433_p7 = pnand %p1431_p6, %p1428_p5 }
 0x924   :  { %1436 = shalt.err (!%p1433_p7)
}
 0x925   :  { %1116 = dma.vmem_to_hbm [thread:$0]  %s1114_s15, 32, %s1706_s7, [#allocation3]  }
 0x926   :  { %1437 = dma.done.wait [#allocation3], 32  }
 0x927   :  { %1438 = vsyncadd [#allocation3], 4294967264 }
 0x928   :  { %1120 = vsyncpa [#allocation3], 1 }

</bundles_post_ra>
